<compile_context>
chip_gen: v6e
topology: v6e:2x2x1
jax: 0.10.0
libtpu: 0.0.40
codegen_flags: <defaults>
</compile_context>

<pallas_src>
import functools

import jax
import jax.numpy as jnp
from jax.experimental import pallas as pl
from jax.experimental.pallas import tpu as pltpu


def _cdiv(a, b):
    return (a + b - 1) // b


def _layernorm_kernel(x_ref, w_ref, b_ref, o_ref, *, eps, d):
    """Plain row-wise LayerNorm over the last axis (width == d)."""
    x = x_ref[...].astype(jnp.float32)
    w = w_ref[...].astype(jnp.float32)
    b = b_ref[...].astype(jnp.float32)
    inv_d = 1.0 / d
    # Two-pass (center, then square) on the VMEM-resident block: no extra HBM
    # traffic and no E[x^2] - mean^2 catastrophic cancellation.
    mean = jnp.sum(x, axis=-1, keepdims=True) * inv_d
    xc = x - mean
    msq = jnp.sum(xc * xc, axis=-1, keepdims=True) * inv_d
    inv_scale = jax.lax.rsqrt(msq + eps)
    o_ref[...] = (xc * inv_scale * w + b).astype(o_ref.dtype)


def _layernorm_folded_kernel(x_ref, w_ref, b_ref, m_ref, o_ref, *, eps):
    """d_model < 128: several logical rows folded into the 128-lane axis.

    m_ref is a (width, width) bf16 block-diagonal averaging matrix
    (M[i, j] = 1/d_model iff lanes i, j share a segment), built on the host
    and DMA'd once (constant index_map), so no per-step constant construction.
    """
    x = x_ref[...].astype(jnp.float32)
    w = w_ref[...].astype(jnp.float32)
    b = b_ref[...].astype(jnp.float32)
    m = m_ref[...]                      # bf16; entries are powers of two -> exact

    def seg_mean(v):
        # hi/lo split keeps ~fp32 accuracy while forcing single-pass bf16 MXU
        # matmuls (explicit bf16 operands, fp32 accumulation).
        hi = v.astype(jnp.bfloat16)
        lo = (v - hi.astype(jnp.float32)).astype(jnp.bfloat16)
        return (jnp.dot(hi, m, preferred_element_type=jnp.float32)
                + jnp.dot(lo, m, preferred_element_type=jnp.float32))

    mean = seg_mean(x)
    xc = x - mean
    msq = seg_mean(xc * xc)
    inv_scale = jax.lax.rsqrt(msq + eps)
    o_ref[...] = (xc * inv_scale * w + b).astype(o_ref.dtype)


def _tpu_hw():
    """(vmem_capacity_bytes, num_tensorcores) with a conservative fallback."""
    vmem = 64 * 1024 * 1024
    try:
        vmem = int(pltpu.get_tpu_info().vmem_capacity_bytes)
    except Exception:
        pass
    # Heuristic: v7x has 64 MiB VMEM per TC and 2 TCs/chip; v5e/v6e have
    # 128 MiB VMEM and a single TC.
    cores = 2 if vmem <= 64 * 1024 * 1024 else 1
    return vmem, cores


def layernorm_pallas(x, w, b, eps=1e-5):
    """x: [..., length]; w, b: [length]. Returns x's shape with dtype w.dtype."""
    orig_shape = x.shape
    d_model = orig_shape[-1]
    out_dtype = jnp.dtype(w.dtype)            # module returns .to(cfg.dtype)
    in_dtype = jnp.dtype(x.dtype)

    x2 = x.reshape(-1, d_model)               # free, contiguous reshape
    n_rows = x2.shape[0]

    vmem_cap, num_cores = _tpu_hw()

    # ---- layout: fold rows into lanes when d_model < 128 (lane-dense I/O).
    nseg = 1
    pad = 0
    if d_model < 128 and 128 % d_model == 0 and (128 // d_model) > 1:
        nseg = 128 // d_model
        pad = (-n_rows) % nseg
        if pad:
            # A few zero rows keep the lane-dense folded layout instead of
            # falling back to masked (<128-lane) partial stores.
            x2 = jnp.pad(x2, ((0, pad), (0, 0)))
    width = nseg * d_model
    rows = (n_rows + pad) // nseg

    if nseg > 1:
        x2 = x2.reshape(rows, width)          # free reshape
        w_in = jnp.tile(w.reshape(-1), nseg).reshape(1, width)
        b_in = jnp.tile(b.reshape(-1), nseg).reshape(1, width)
        lane = jnp.arange(width, dtype=jnp.int32) // d_model
        m = ((lane[:, None] == lane[None, :]).astype(jnp.float32)
             * (1.0 / d_model)).astype(jnp.bfloat16)
    else:
        w_in = w.reshape(1, width)
        b_in = b.reshape(1, width)

    in_bytes = in_dtype.itemsize
    out_bytes = out_dtype.itemsize
    param_bytes = jnp.dtype(w.dtype).itemsize

    # Packed sublane tile of the I/O dtypes: 8 fp32 / 16 bf16 / 32 int8.
    sub = max(8, 8 * (4 // in_bytes), 8 * (4 // out_bytes))

    # ---- grid-step target.
    total_io = rows * width * (in_bytes + out_bytes)
    if total_io <= 4 * 1024 * 1024:
        min_steps = 1                          # tiny: per-step overhead dominates
    else:
        min_steps = 4 if num_cores >= 2 else 2  # 2/core on v7x; overlap on 1 TC

    # ---- block_rows from the real VMEM footprint: double-buffered in + out
    # plus in-kernel fp32 temporaries (~4 fp32 copies of the block).
    per_row = 2 * width * (in_bytes + out_bytes) + 4 * width * 4
    budget = vmem_cap // 2
    block_rows = max(sub, (budget // per_row) // sub * sub)

    if block_rows * min_steps > rows:
        if min_steps > 1 and rows >= min_steps * sub:
            block_rows = _cdiv(_cdiv(rows, min_steps), sub) * sub
        else:
            block_rows = min(block_rows, rows)  # single full-extent block
    block_rows = min(block_rows, rows)
    if block_rows < rows:
        block_rows = max(sub, (block_rows // sub) * sub)

    grid = (_cdiv(rows, block_rows),)

    # ---- VMEM limit derived from the actual footprint (+ headroom), capped
    # at physical VMEM (64 MiB/TC on v7x, 128 MiB on v5e/v6e).
    footprint = (2 * block_rows * width * (in_bytes + out_bytes)   # dbl-buf I/O
                 + 4 * block_rows * width * 4                      # fp32 temps
                 + 4 * width * param_bytes)                        # w, b
    if nseg > 1:
        footprint += 2 * width * width * 2                         # bf16 M
    vmem_limit = int(min(vmem_cap, max(footprint + 8 * 1024 * 1024,
                                       16 * 1024 * 1024)))

    cost = pl.CostEstimate(
        flops=10 * rows * width,
        transcendentals=rows * nseg,
        bytes_accessed=rows * width * (in_bytes + out_bytes) + 2 * width * param_bytes,
    )

    x_spec = pl.BlockSpec((block_rows, width), lambda i: (i, 0))
    p_spec = pl.BlockSpec((1, width), lambda i: (0, 0))

    if nseg > 1:
        kernel = functools.partial(_layernorm_folded_kernel, eps=eps)
        in_specs = [x_spec, p_spec, p_spec,
                    pl.BlockSpec((width, width), lambda i: (0, 0))]
        args = (x2, w_in, b_in, m)
    else:
        kernel = functools.partial(_layernorm_kernel, eps=eps, d=d_model)
        in_specs = [x_spec, p_spec, p_spec]
        args = (x2, w_in, b_in)

    out = pl.pallas_call(
        kernel,
        out_shape=jax.ShapeDtypeStruct((rows, width), out_dtype),
        grid_spec=pltpu.PrefetchScalarGridSpec(
            num_scalar_prefetch=0,
            grid=grid,
            in_specs=in_specs,
            out_specs=pl.BlockSpec((block_rows, width), lambda i: (i, 0)),
        ),
        compiler_params=pltpu.CompilerParams(
            dimension_semantics=("parallel",),
            vmem_limit_bytes=vmem_limit,
        ),
        cost_estimate=cost,
    )(*args)

    if nseg > 1:
        out = out.reshape(rows * nseg, d_model)
        if pad:
            out = out[:n_rows]
    return out.reshape(orig_shape)


def layernorm_ref(x, w, b, eps=1e-5):
    x = x.astype(jnp.float32)
    x = x - jnp.mean(x, axis=-1, keepdims=True)
    scale = jnp.sqrt(jnp.mean(x * x, axis=-1, keepdims=True) + eps)
    return ((x / scale) * w + b).astype(w.dtype)


if __name__ == "__main__":
    eps = 1e-5

    # [batch, pos, d_model] with d_model < 128 -> exercises the folded,
    # lane-dense path (resident bf16 averaging matrix, hi/lo MXU means).
    batch, pos, d_model = 2, 16, 32
    x = jax.random.normal(jax.random.PRNGKey(0), (batch, pos, d_model),
                          dtype=jnp.float32)
    w = jnp.ones((d_model,), dtype=jnp.float32)    # nn.Parameter(torch.ones)
    b = jnp.zeros((d_model,), dtype=jnp.float32)   # nn.Parameter(torch.zeros)

    out = jax.block_until_ready(layernorm_pallas(x, w, b, eps=eps))
    ref = layernorm_ref(x, w, b, eps=eps)
    assert out.shape == (batch, pos, d_model)
    assert out.dtype == jnp.float32
    assert jnp.allclose(out, ref, atol=1e-4, rtol=1e-4)

    # Plain path (d_model multiple of 128) with non-trivial parameters.
    k1, k2, k3 = jax.random.split(jax.random.PRNGKey(1), 3)
    b2_, p2_, d2_ = 2, 8, 128
    x2 = jax.random.normal(k1, (b2_, p2_, d2_), dtype=jnp.float32)
    w2 = jax.random.normal(k2, (d2_,), dtype=jnp.float32)
    b2 = jax.random.normal(k3, (d2_,), dtype=jnp.float32)
    out2 = jax.block_until_ready(layernorm_pallas(x2, w2, b2, eps=eps))
    ref2 = layernorm_ref(x2, w2, b2, eps=eps)
    assert out2.shape == (b2_, p2_, d2_)
    assert jnp.allclose(out2, ref2, atol=1e-4, rtol=1e-4)

    # Folded path with ragged row count (pads to the fold factor, stays
    # lane-dense) and bf16 I/O (sublane tile 16).
    k4 = jax.random.PRNGKey(2)
    x3 = jax.random.normal(k4, (3, 7, 64), dtype=jnp.bfloat16)
    w3 = jnp.ones((64,), dtype=jnp.bfloat16)
    b3 = jnp.zeros((64,), dtype=jnp.bfloat16)
    out3 = jax.block_until_ready(layernorm_pallas(x3, w3, b3, eps=eps))
    ref3 = layernorm_ref(x3, w3, b3, eps=eps)
    assert out3.shape == (3, 7, 64)
    assert out3.dtype == jnp.bfloat16
    assert jnp.allclose(out3.astype(jnp.float32), ref3.astype(jnp.float32),
                        atol=2e-2, rtol=2e-2)

    print("KERNEL_OK")
</pallas_src>

<mosaic_0001>
module attributes {stable_mosaic.version = 11 : i64} {
  func.func @_layernorm_folded_kernel(%arg0: i32, %arg1: memref<8x128xf32, #tpu.memory_space<vmem>>, %arg2: memref<1x128xf32, #tpu.memory_space<vmem>>, %arg3: memref<1x128xf32, #tpu.memory_space<vmem>>, %arg4: memref<128x128xbf16, #tpu.memory_space<vmem>>, %arg5: memref<8x128xf32, #tpu.memory_space<vmem>>) attributes {dimension_semantics = [#tpu.dimension_semantics<parallel>], iteration_bounds = array<i64: 1>, scalar_prefetch = 0 : i64, scratch_operands = 0 : i64, tpu.core_type = #tpu.core_type<tc>, window_params = [{transform_indices = @transform_0, window_bounds = array<i64: 8, 128>}, {pipeline_mode = #tpu.pipeline_mode<synchronous>, transform_indices = @transform_1, window_bounds = array<i64: 1, 128>}, {pipeline_mode = #tpu.pipeline_mode<synchronous>, transform_indices = @transform_2, window_bounds = array<i64: 1, 128>}, {pipeline_mode = #tpu.pipeline_mode<synchronous>, transform_indices = @transform_3, window_bounds = array<i64: 128, 128>}, {transform_indices = @transform_4, window_bounds = array<i64: 8, 128>}]} {
    %c0 = arith.constant 0 : index
    %c0_0 = arith.constant 0 : index
    %0 = vector.load %arg1[%c0, %c0_0] : memref<8x128xf32, #tpu.memory_space<vmem>>, vector<8x128xf32>
    %c0_1 = arith.constant 0 : index
    %c0_2 = arith.constant 0 : index
    %1 = vector.load %arg2[%c0_1, %c0_2] : memref<1x128xf32, #tpu.memory_space<vmem>>, vector<1x128xf32>
    %c0_3 = arith.constant 0 : index
    %c0_4 = arith.constant 0 : index
    %2 = vector.load %arg3[%c0_3, %c0_4] : memref<1x128xf32, #tpu.memory_space<vmem>>, vector<1x128xf32>
    %c0_5 = arith.constant 0 : index
    %c0_6 = arith.constant 0 : index
    %3 = vector.load %arg4[%c0_5, %c0_6] : memref<128x128xbf16, #tpu.memory_space<vmem>>, vector<128x128xbf16>
    %4 = arith.truncf %0 : vector<8x128xf32> to vector<8x128xbf16>
    %5 = arith.extf %4 : vector<8x128xbf16> to vector<8x128xf32>
    %6 = arith.subf %0, %5 : vector<8x128xf32>
    %7 = arith.truncf %6 : vector<8x128xf32> to vector<8x128xbf16>
    %cst = arith.constant dense<0.000000e+00> : vector<8x128xf32>
    %8 = tpu.matmul %4, %3, %cst {dimension_numbers = #tpu.dot_dimension_numbers<[1], [0], [0], [1], [0, 0, 1, 1], [], []>} : vector<8x128xbf16>, vector<128x128xbf16>, vector<8x128xf32> -> vector<8x128xf32>
    %cst_7 = arith.constant dense<0.000000e+00> : vector<8x128xf32>
    %9 = tpu.matmul %7, %3, %cst_7 {dimension_numbers = #tpu.dot_dimension_numbers<[1], [0], [0], [1], [0, 0, 1, 1], [], []>} : vector<8x128xbf16>, vector<128x128xbf16>, vector<8x128xf32> -> vector<8x128xf32>
    %10 = arith.addf %8, %9 : vector<8x128xf32>
    %11 = arith.subf %0, %10 : vector<8x128xf32>
    %12 = arith.mulf %11, %11 : vector<8x128xf32>
    %13 = arith.truncf %12 : vector<8x128xf32> to vector<8x128xbf16>
    %14 = arith.extf %13 : vector<8x128xbf16> to vector<8x128xf32>
    %15 = arith.subf %12, %14 : vector<8x128xf32>
    %16 = arith.truncf %15 : vector<8x128xf32> to vector<8x128xbf16>
    %cst_8 = arith.constant dense<0.000000e+00> : vector<8x128xf32>
    %17 = tpu.matmul %13, %3, %cst_8 {dimension_numbers = #tpu.dot_dimension_numbers<[1], [0], [0], [1], [0, 0, 1, 1], [], []>} : vector<8x128xbf16>, vector<128x128xbf16>, vector<8x128xf32> -> vector<8x128xf32>
    %cst_9 = arith.constant dense<0.000000e+00> : vector<8x128xf32>
    %18 = tpu.matmul %16, %3, %cst_9 {dimension_numbers = #tpu.dot_dimension_numbers<[1], [0], [0], [1], [0, 0, 1, 1], [], []>} : vector<8x128xbf16>, vector<128x128xbf16>, vector<8x128xf32> -> vector<8x128xf32>
    %19 = arith.addf %17, %18 : vector<8x128xf32>
    %cst_10 = arith.constant 9.99999974E-6 : f32
    %20 = vector.broadcast %cst_10 : f32 to vector<8x128xf32>
    %21 = arith.addf %19, %20 : vector<8x128xf32>
    %22 = math.rsqrt %21 : vector<8x128xf32>
    %23 = arith.mulf %11, %22 : vector<8x128xf32>
    %24 = vector.broadcast %1 : vector<1x128xf32> to vector<8x128xf32>
    %25 = arith.mulf %23, %24 : vector<8x128xf32>
    %26 = vector.broadcast %2 : vector<1x128xf32> to vector<8x128xf32>
    %27 = arith.addf %25, %26 : vector<8x128xf32>
    %c0_11 = arith.constant 0 : index
    %c0_12 = arith.constant 0 : index
    %28 = vector.load %arg5[%c0_11, %c0_12] : memref<8x128xf32, #tpu.memory_space<vmem>>, vector<8x128xf32>
    tpu.vector_store %arg5[%c0_11, %c0_12], %27 {strides = array<i32>} : memref<8x128xf32, #tpu.memory_space<vmem>>, vector<8x128xf32>,
    return
  }
  func.func @transform_0(%arg0: i32) -> (i32, i32) {
    %c0_i32 = arith.constant 0 : i32
    %c0_i32_0 = arith.constant 0 : i32
    return %arg0, %c0_i32 : i32, i32
  }
  func.func @transform_1(%arg0: i32) -> (i32, i32) {
    %c0_i32 = arith.constant 0 : i32
    %c0_i32_0 = arith.constant 0 : i32
    %c0_i32_1 = arith.constant 0 : i32
    return %c0_i32, %c0_i32_0 : i32, i32
  }
  func.func @transform_2(%arg0: i32) -> (i32, i32) {
    %c0_i32 = arith.constant 0 : i32
    %c0_i32_0 = arith.constant 0 : i32
    %c0_i32_1 = arith.constant 0 : i32
    return %c0_i32, %c0_i32_0 : i32, i32
  }
  func.func @transform_3(%arg0: i32) -> (i32, i32) {
    %c0_i32 = arith.constant 0 : i32
    %c0_i32_0 = arith.constant 0 : i32
    %c0_i32_1 = arith.constant 0 : i32
    return %c0_i32, %c0_i32_0 : i32, i32
  }
  func.func @transform_4(%arg0: i32) -> (i32, i32) {
    %c0_i32 = arith.constant 0 : i32
    %c0_i32_0 = arith.constant 0 : i32
    return %arg0, %c0_i32 : i32, i32
  }
}

</mosaic_0001>

<bundles_post_ra>
// kernel: tpu_custom_call.1
= control target key start
LH: loop header
LB: loop body
LE: loop exit
PB: predicated region body
PF: predicated region fallthrough
CT: control target
= control target key end

     0   :  { %9 = vsyncpa [#allocation3], 0  ;;  %s618_s0 = inlined_call_operand.hbm [shape: f32[8,128], index: 0, kind: input, shape index: {}]   ;;  %s619_s1 = inlined_call_operand.vmem [shape: f32[1,128], index: 1, kind: input, shape index: {}]   ;;  %s620_s2 = inlined_call_operand.vmem [shape: f32[1,128], index: 2, kind: input, shape index: {}]   ;;  %s621_s3 = inlined_call_operand.hbm [shape: bf16[128,128], index: 3, kind: input, shape index: {}]   ;;  %s622_s4 = inlined_call_operand.hbm [shape: f32[8,128], index: 4, kind: output, shape index: {}]  }
   0x1   :  { %10 = vsyncpa [#allocation6], 0 }
   0x2   :  { %11 = vsyncpa [#allocation4], 0  ;;  %s525_s15 = smov [#allocation2]   ;;  %s526_s17 = smov [#allocation5]  }
   0x3   :  { %s18_s16 = sshll.u32 %s525_s15, 4  ;;  %s31_s18 = sshll.u32 %s526_s17, 4  ;;  %s19_s16 = int_to_ptr.vmem [resolvable:$true] %s18_s16  ;;  %s32_s18 = int_to_ptr.vmem [resolvable:$true] %s31_s18 }
   0x4   :  { %s467_s19 = scalar_lea.vmem %s19_s16, 128  ;;  %p472_p1 = scmp.lt.s32.totalorder %s19_s16, %s19_s16 }
   0x5   :  { %p468_p0 = scmp.ne.s32.totalorder %s19_s16, %s467_s19  ;;  %p473_p2 = scmp.lt.s32.totalorder %s467_s19, %s467_s19 }
   0x7   :  { %p474_p3 = por %p473_p2, %p472_p1 }
   0x9   :  { %p475_p4 = pnand %p474_p3, %p468_p0 }
   0xb   :  { %478 = shalt.err (!%p475_p4)
}
   0xc   :  { %21 = dma.hbm_to_vmem [thread:$0]  %s618_s0, 128, %s19_s16, [#allocation3]  }
   0xd   :  { %s487_s22 = scalar_lea.vmem %s32_s18, 1024  ;;  %p492_p6 = scmp.lt.s32.totalorder %s32_s18, %s32_s18 }
   0xe   :  { %p488_p5 = scmp.ne.s32.totalorder %s32_s18, %s487_s22  ;;  %p493_p7 = scmp.lt.s32.totalorder %s487_s22, %s487_s22 }
  0x10   :  { %p494_p8 = por %p493_p7, %p492_p6 }
  0x12   :  { %p495_p9 = pnand %p494_p8, %p488_p5 }
  0x14   :  { %498 = shalt.err (!%p495_p9)
}
  0x15   :  { %s527_s23 = smov 64   ;;  %s528_s24 = smov 4  }
  0x16   :  { %37 = dma.hbm_to_vmem [thread:$0]  %s621_s3, 1024, %s32_s18, [#allocation6], %s527_s23, %s527_s23, %s528_s24  }
  0x17   :  { %519 = dma.done.wait [#allocation3], 128  }
  0x18   :  { %520 = vsyncadd [#allocation3], 4294967168 }
  0x19   :  { %521 = dma.done.wait [#allocation6], 1024  }
  0x1a   :  { %522 = vsyncadd [#allocation6], 4294966272  ;;  %v529_v0 = vmov 0.0   ;;  %vm530_vm0 = vmmov 0   ;;  %v449_v1 = vld [vmem:[#allocation5 + $0x38] sm:$0xff]   ;;  %v450_v2 = vld [vmem:[#allocation5 + $0x30] sm:$0xff]  }
  0x1b   :  { %362 = vmatprep.subr.bf16.mxu0 %v529_v0  ;;  %382 = vmatprep.subr.bf16.mxu1 %v529_v0  ;;  %v451_v3 = vld [vmem:[#allocation5 + $0x28] sm:$0xff]   ;;  %v452_v4 = vld [vmem:[#allocation5 + $0x20] sm:$0xff]   ;;  %v453_v5 = vld [vmem:[#allocation5 + $0x18] sm:$0xff]   ;;  %s531_s29 = smov [#allocation7]  }
  0x1c   :  { %378 = vmatprep.mubr.msk.bf16.mxu0 %vm530_vm0, %v529_v0  ;;  %398 = vmatprep.mubr.msk.bf16.mxu1 %vm530_vm0, %v529_v0  ;;  %v575_v6 = vld [vmem:[#allocation2] sm:$0xff]  ;;  %v454_v8 = vld [vmem:[#allocation5 + $0x10] sm:$0xff]   ;;  %v455_v10 = vld [vmem:[#allocation5 + $0x8] sm:$0xff]   ;;  %s306_s30 = sshll.u32 %s531_s29, 4  ;;  %s307_s30 = int_to_ptr.vmem [resolvable:$true] %s306_s30 }
  0x1d   :  { %363 = vmatpush3.bf16.msra.mxu0 %v449_v1  ;;  %383 = vmatpush3.bf16.msra.mxu1 %v449_v1  ;;  %v64_v7 = vpack.c.bf16 %v575_v6, %v575_v6  ;;  %v456_v12 = vld [vmem:[#allocation5] sm:$0xff]   ;;  %v324_v40 = vld [vmem:[%s619_s1] ss:$0 sm:$0xff]  ;;  %s499_s5 = scalar_lea.vmem %s307_s30, 128  ;;  %p504_p11 = scmp.lt.s32.totalorder %s307_s30, %s307_s30 }
  0x1e   :  { %364 = vmatprep.subr.bf16.mxu0 %v529_v0  ;;  %384 = vmatprep.subr.bf16.mxu1 %v529_v0  ;;  %v325_v42 = vld [vmem:[%s620_s2] ss:$0 sm:$0xff]  ;;  %p500_p10 = scmp.ne.s32.totalorder %s307_s30, %s499_s5  ;;  %p505_p12 = scmp.lt.s32.totalorder %s499_s5, %s499_s5 }
  0x1f   :  { %v65_v9 = vunpack.c.l.bf16 %v64_v7 }
  0x20   :  { %p506_p13 = por %p505_p12, %p504_p11 }
  0x21   :  { %365 = vmatpush3.bf16.msra.mxu0 %v450_v2  ;;  %385 = vmatpush3.bf16.msra.mxu1 %v450_v2  ;;  %v66_v11 = vsub.f32 %v575_v6, %v65_v9 }
  0x22   :  { %366 = vmatprep.subr.bf16.mxu0 %v529_v0  ;;  %386 = vmatprep.subr.bf16.mxu1 %v529_v0  ;;  %p507_p0 = pnand %p506_p13, %p500_p10 }
  0x23   :  { %v67_v13 = vpack.c.bf16 %v66_v11, %v66_v11 }
  0x25   :  { %367 = vmatpush3.bf16.msra.mxu0 %v451_v3  ;;  %387 = vmatpush3.bf16.msra.mxu1 %v451_v3 }
  0x26   :  { %368 = vmatprep.subr.bf16.mxu0 %v529_v0  ;;  %388 = vmatprep.subr.bf16.mxu1 %v529_v0 }
  0x29   :  { %369 = vmatpush3.bf16.msra.mxu0 %v452_v4  ;;  %389 = vmatpush3.bf16.msra.mxu1 %v452_v4 }
  0x2a   :  { %370 = vmatprep.subr.bf16.mxu0 %v529_v0  ;;  %390 = vmatprep.subr.bf16.mxu1 %v529_v0 }
  0x2d   :  { %371 = vmatpush3.bf16.msra.mxu0 %v453_v5  ;;  %391 = vmatpush3.bf16.msra.mxu1 %v453_v5 }
  0x2e   :  { %372 = vmatprep.subr.bf16.mxu0 %v529_v0  ;;  %392 = vmatprep.subr.bf16.mxu1 %v529_v0 }
  0x31   :  { %373 = vmatpush3.bf16.msra.mxu0 %v454_v8  ;;  %393 = vmatpush3.bf16.msra.mxu1 %v454_v8 }
  0x32   :  { %374 = vmatprep.subr.bf16.mxu0 %v529_v0  ;;  %394 = vmatprep.subr.bf16.mxu1 %v529_v0 }
  0x35   :  { %375 = vmatpush3.bf16.msra.mxu0 %v455_v10  ;;  %395 = vmatpush3.bf16.msra.mxu1 %v455_v10 }
  0x36   :  { %376 = vmatprep.subr.bf16.mxu0 %v529_v0  ;;  %396 = vmatprep.subr.bf16.mxu1 %v529_v0 }
  0x39   :  { %377 = vmatpush3.bf16.msra.mxu0 %v456_v12  ;;  %397 = vmatpush3.bf16.msra.mxu1 %v456_v12 }
  0x3a   :  { %422 = vmatprep.subr.bf16.mxu1 %v529_v0  ;;  %402 = vmatprep.subr.bf16.mxu0 %v529_v0 }
  0x3c   :  { %379 = vmatmul.mubr.bf16.vlgmr.msra.gmra.mxu0 %v67_v13  ;;  %399 = vmatmul.mubr.bf16.vlgmr.msra.gmra.mxu1 %v64_v7 }
  0x3d   :  { %423 = vmatpush3.bf16.msra.mxu1 %v449_v1  ;;  %403 = vmatpush3.bf16.msra.mxu0 %v449_v1 }
  0x3e   :  { %424 = vmatprep.subr.bf16.mxu1 %v529_v0  ;;  %404 = vmatprep.subr.bf16.mxu0 %v529_v0 }
  0x3f   :  { %438 = vmatprep.mubr.msk.bf16.mxu1 %vm530_vm0, %v529_v0  ;;  %418 = vmatprep.mubr.msk.bf16.mxu0 %vm530_vm0, %v529_v0 }
  0x41   :  { %425 = vmatpush3.bf16.msra.mxu1 %v450_v2  ;;  %405 = vmatpush3.bf16.msra.mxu0 %v450_v2 }
  0x42   :  { %426 = vmatprep.subr.bf16.mxu1 %v529_v0  ;;  %406 = vmatprep.subr.bf16.mxu0 %v529_v0 }
  0x45   :  { %427 = vmatpush3.bf16.msra.mxu1 %v451_v3  ;;  %407 = vmatpush3.bf16.msra.mxu0 %v451_v3 }
  0x46   :  { %428 = vmatprep.subr.bf16.mxu1 %v529_v0  ;;  %408 = vmatprep.subr.bf16.mxu0 %v529_v0 }
  0x49   :  { %429 = vmatpush3.bf16.msra.mxu1 %v452_v4  ;;  %409 = vmatpush3.bf16.msra.mxu0 %v452_v4 }
  0x4a   :  { %430 = vmatprep.subr.bf16.mxu1 %v529_v0  ;;  %410 = vmatprep.subr.bf16.mxu0 %v529_v0 }
  0x4d   :  { %431 = vmatpush3.bf16.msra.mxu1 %v453_v5  ;;  %411 = vmatpush3.bf16.msra.mxu0 %v453_v5 }
  0x4e   :  { %432 = vmatprep.subr.bf16.mxu1 %v529_v0  ;;  %412 = vmatprep.subr.bf16.mxu0 %v529_v0 }
  0x51   :  { %433 = vmatpush3.bf16.msra.mxu1 %v454_v8  ;;  %413 = vmatpush3.bf16.msra.mxu0 %v454_v8 }
  0x52   :  { %434 = vmatprep.subr.bf16.mxu1 %v529_v0  ;;  %414 = vmatprep.subr.bf16.mxu0 %v529_v0 }
  0x55   :  { %435 = vmatpush3.bf16.msra.mxu1 %v455_v10  ;;  %415 = vmatpush3.bf16.msra.mxu0 %v455_v10 }
  0x56   :  { %436 = vmatprep.subr.bf16.mxu1 %v529_v0  ;;  %416 = vmatprep.subr.bf16.mxu0 %v529_v0 }
  0x59   :  { %437 = vmatpush3.bf16.msra.mxu1 %v456_v12  ;;  %417 = vmatpush3.bf16.msra.mxu0 %v456_v12 }
  0xfc   :  { %v150_v14 = vpop.f32.mrf.mxu0  ;;  %v190_v15 = vpop.f32.mrf.mxu1 }
  0xfd   :  { %v191_v16 = vadd.f32 %v190_v15, %v150_v14 }
  0xfe   :  { %v380_v17 = vpop.f32.mrf.mxu0  ;;  %v400_v18 = vpop.f32.mrf.mxu1 }
  0xff   :  { %v196_v19 = vsub.f32 %v575_v6, %v191_v16 }
 0x100   :  { %v153_v20 = vpop.f32.mrf.mxu0  ;;  %v193_v21 = vpop.f32.mrf.mxu1 }
 0x101   :  { %v197_v22 = vmul.f32 %v196_v19, %v196_v19 }
 0x102   :  { %v381_v23 = vpop.f32.mrf.mxu0  ;;  %v401_v24 = vpop.f32.mrf.mxu1 }
 0x103   :  { %v198_v25 = vpack.c.bf16 %v197_v22, %v197_v22 }
 0x105   :  { %v199_v26 = vunpack.c.l.bf16 %v198_v25  ;;  %439 = vmatmul.mubr.bf16.vlgmr.msra.gmra.mxu1 %v198_v25 }
 0x107   :  { %v200_v27 = vsub.f32 %v197_v22, %v199_v26 }
 0x109   :  { %v201_v28 = vpack.c.bf16 %v200_v27, %v200_v27 }
 0x10b   :  { %419 = vmatmul.mubr.bf16.vlgmr.msra.gmra.mxu0 %v201_v28 }
 0x1c5   :  { %v276_v29 = vpop.f32.mrf.mxu1 }
 0x1c7   :  { %v440_v30 = vpop.f32.mrf.mxu1 }
 0x1c9   :  { %v279_v31 = vpop.f32.mrf.mxu1 }
 0x1cb   :  { %v236_v32 = vpop.f32.mrf.mxu0  ;;  %v441_v33 = vpop.f32.mrf.mxu1 }
 0x1cc   :  { %v277_v34 = vadd.f32 %v276_v29, %v236_v32 }
 0x1cd   :  { %v420_v35 = vpop.f32.mrf.mxu0 }
 0x1ce   :  { %v282_v36 = vadd.f32 1e-05, %v277_v34 }
 0x1cf   :  { %v239_v37 = vpop.f32.mrf.mxu0 }
 0x1d0   :  { %457 = vrsqrt.f32 %v282_v36 }
 0x1d1   :  { %v421_v38 = vpop.f32.mrf.mxu0 }
 0x1dd   :  { %v458_v39 = vpop.eup %457 }
 0x1de   :  { %v284_v41 = vmul.f32 %v458_v39, %v196_v19 }
 0x1e0   :  { %v291_v43 = vmul.f32 %v324_v40, %v284_v41 }
 0x1e2   :  { %v298_v44 = vadd.f32 %v325_v42, %v291_v43 }
 0x1e4   :  { %299 = vst [vmem:[#allocation7] sm:$0xff] %v298_v44 }
 0x1e5   :  { %510 = shalt.err (!%p507_p0)
}
 0x1e6   :  { %309 = dma.vmem_to_hbm [thread:$0]  %s307_s30, 128, %s622_s4, [#allocation4]  }
 0x1e7   :  { %523 = dma.done.wait [#allocation4], 128  }
 0x1e8   :  { %524 = vsyncadd [#allocation4], 4294967168 }
 0x1e9   :  { %313 = vsyncpa [#allocation3], 1 }
 0x1ea   :  { %314 = vsyncpa [#allocation6], 1 }
 0x1eb   :  { %315 = vsyncpa [#allocation4], 1 }

</bundles_post_ra>
